<compile_context>
chip_gen: v5e
topology: v5e:2x2
jax: 0.10.0
libtpu: 0.0.40
codegen_flags: <defaults>
</compile_context>

<pallas_src>
import functools

import numpy as np
import jax
import jax.numpy as jnp
from jax.experimental import pallas as pl
from jax.experimental.pallas import tpu as pltpu

CIN, COUT, KH, KW, STRIDE, PAD = 3, 8, 3, 3, 2, 1
LANE = 128


def _round_up(x, m):
    return (x + m - 1) // m * m


def _conv_kernel(yf_ref, w_ref, b_ref, out_ref, *, wq, m_store):
    """One image per grid step: stride-2 3x3 conv as 4 shifted bf16 matmuls, f32 accumulation.

    yf_ref : (1, 4*CIN, L_PAD) bf16  space-to-depth slab (flat spatial, zero padded)
    w_ref  : (4, COUT, 4*CIN)  bf16  per-(dh,dw) weight matrices (2x2 stride-1 equivalent conv)
    b_ref  : (COUT, 1)         f32   bias (broadcast over lanes)
    out_ref: (1, COUT, M_STORE) f32  lane-dense flat output (junk columns stripped by wrapper)
    """
    acc = jnp.zeros((COUT, m_store), jnp.float32)
    for dh in range(2):
        for dw in range(2):
            shift = dh * wq + dw                                   # static lane offset
            tap = yf_ref[0, :, pl.ds(shift, m_store)]              # (4*CIN, M_STORE) bf16
            acc = acc + jnp.dot(w_ref[dh * 2 + dw], tap,
                                preferred_element_type=jnp.float32)
    out_ref[0] = acc + b_ref[...]


def masked_intermediate_layer(images, image_masks, weight, bias):
    """images: (N, CIN, H, W) f32 NCHW; image_masks: (N, Hin, Win) bool.
    Returns (tensor (N, COUT, Hout, Wout) f32, mask (N, Hout, Wout) bool) — same as the module."""
    N, cin, H, W = images.shape
    assert cin == CIN
    Hout = (H + 2 * PAD - KH) // STRIDE + 1
    Wout = (W + 2 * PAD - KW) // STRIDE + 1

    # ---- space-to-depth prep in XLA (single ~input-sized bf16 layout transform, no im2col) ----
    Hp, Wp = H + 2 * PAD, W + 2 * PAD
    Hp2, Wp2 = Hp + (Hp & 1), Wp + (Wp & 1)          # even extents so parity split is exact
    Hq, Wq = Hp2 // 2, Wp2 // 2                      # == Hout + 1, Wout + 1
    C4 = 4 * CIN
    x_pad = jnp.pad(images, ((0, 0), (0, 0), (PAD, PAD + Hp2 - Hp), (PAD, PAD + Wp2 - Wp)))
    # x_pad[n, c, 2r+ph, 2s+pw]  ->  y[n, c*4 + ph*2 + pw, r*Wq + s]
    y = (x_pad.reshape(N, CIN, Hq, 2, Wq, 2)
              .transpose(0, 1, 3, 5, 2, 4)
              .reshape(N, C4, Hq * Wq))
    M_WIDE = Hout * Wq                               # flat output incl. one junk column per row
    M_STORE = _round_up(M_WIDE, LANE)                # lane-dense unmasked stores
    L_PAD = _round_up(M_STORE + Wq + 2, LANE)        # room for the max (dh,dw) shift
    yf = jnp.pad(y, ((0, 0), (0, 0), (0, L_PAD - Hq * Wq))).astype(jnp.bfloat16)

    # ---- weights: 3x3 stride-2 conv == 2x2 stride-1 conv over the space-to-depth channels ----
    w2 = jnp.zeros((4, COUT, C4), jnp.float32)
    for dh in range(2):
        for dw in range(2):
            for ph in range(2):
                for pw in range(2):
                    kh, kw = 2 * dh + ph, 2 * dw + pw
                    if kh < KH and kw < KW:
                        w2 = w2.at[dh * 2 + dw, :, ph * 2 + pw::4].set(weight[:, :, kh, kw])
    w2 = w2.astype(jnp.bfloat16)
    b2 = bias.reshape(COUT, 1).astype(jnp.float32)

    kernel = functools.partial(_conv_kernel, wq=Wq, m_store=M_STORE)
    conv_wide = pl.pallas_call(
        kernel,
        out_shape=jax.ShapeDtypeStruct((N, COUT, M_STORE), jnp.float32),
        grid=(N,),
        in_specs=[
            pl.BlockSpec((1, C4, L_PAD), lambda n: (n, 0, 0)),
            pl.BlockSpec((4, COUT, C4), lambda n: (0, 0, 0)),
            pl.BlockSpec((COUT, 1), lambda n: (0, 0)),
        ],
        out_specs=pl.BlockSpec((1, COUT, M_STORE), lambda n: (n, 0, 0)),
        compiler_params=pltpu.CompilerParams(
            dimension_semantics=("parallel",),       # v7x: 2 TCs each take half the batch
            vmem_limit_bytes=48 * 1024 * 1024,       # headroom under v7x's 64 MiB physical VMEM
        ),
    )(yf, w2, b2)

    # Strip junk columns and present NCHW exactly like the PyTorch module (tiny at these sizes).
    # TODO(synk): at real backbone sizes keep the flat (N, COUT, M) layout for the next fused op.
    tensor = conv_wide[:, :, :M_WIDE].reshape(N, COUT, Hout, Wq)[..., :Wout]

    # Mask nearest-neighbour resize (F.interpolate default 'nearest') hoisted to an XLA gather:
    # it is ~KB sized; keeping it in-kernel forced 8-lane masked stores for no benefit.
    Hin, Win = image_masks.shape[-2:]
    idx_h = jnp.asarray(np.minimum(np.floor(np.arange(Hout) * Hin / Hout), Hin - 1).astype(np.int32))
    idx_w = jnp.asarray(np.minimum(np.floor(np.arange(Wout) * Win / Wout), Win - 1).astype(np.int32))
    mask = image_masks[:, idx_h][:, :, idx_w]
    return tensor, mask


# ------------------------------------- main --------------------------------------
if __name__ == "__main__":
    key = jax.random.PRNGKey(0)
    k_img, k_mask, k_w, k_b = jax.random.split(key, 4)

    N, H, W = 2, 16, 16
    images = jax.random.normal(k_img, (N, CIN, H, W), dtype=jnp.float32)         # NCHW
    image_masks = jax.random.bernoulli(k_mask, 0.3, (N, H, W))                   # bool
    weight = 0.1 * jax.random.normal(k_w, (COUT, CIN, KH, KW), dtype=jnp.float32)
    bias = 0.1 * jax.random.normal(k_b, (COUT,), dtype=jnp.float32)

    tensor, mask = masked_intermediate_layer(images, image_masks, weight, bias)
    tensor = jax.block_until_ready(tensor)
    mask = jax.block_until_ready(mask)

    # -- sanity checks against pure-JAX / numpy references --
    ref_conv = jax.lax.conv_general_dilated(
        images, weight, window_strides=(STRIDE, STRIDE),
        padding=((PAD, PAD), (PAD, PAD)),
        dimension_numbers=("NCHW", "OIHW", "NCHW"),
    ) + bias.reshape(1, COUT, 1, 1)
    assert tensor.shape == ref_conv.shape == (N, COUT, 8, 8)
    assert jnp.allclose(tensor, ref_conv, atol=3e-2, rtol=3e-2)   # bf16-in / f32-acc tolerance

    Hout, Wout = tensor.shape[-2], tensor.shape[-1]
    idx_h = np.minimum(np.floor(np.arange(Hout) * H / Hout), H - 1).astype(np.int32)
    idx_w = np.minimum(np.floor(np.arange(Wout) * W / Wout), W - 1).astype(np.int32)
    ref_mask = np.asarray(image_masks)[:, idx_h][:, :, idx_w]
    assert mask.dtype == jnp.bool_ and mask.shape == (N, Hout, Wout)
    assert np.array_equal(np.asarray(mask), ref_mask)

    print("KERNEL_OK")
</pallas_src>

<mosaic_0001>
module attributes {stable_mosaic.version = 11 : i64} {
  func.func @_conv_kernel(%arg0: i32, %arg1: memref<1x12x256xbf16, #tpu.memory_space<vmem>>, %arg2: memref<4x8x12xbf16, #tpu.memory_space<vmem>>, %arg3: memref<8x1xf32, #tpu.memory_space<vmem>>, %arg4: memref<1x8x128xf32, #tpu.memory_space<vmem>>) attributes {dimension_semantics = [#tpu.dimension_semantics<parallel>], iteration_bounds = array<i64: 2>, scalar_prefetch = 0 : i64, scratch_operands = 0 : i64, tpu.core_type = #tpu.core_type<tc>, window_params = [{transform_indices = @transform_0, window_bounds = array<i64: 1, 12, 256>}, {pipeline_mode = #tpu.pipeline_mode<synchronous>, transform_indices = @transform_1, window_bounds = array<i64: 4, 8, 12>}, {pipeline_mode = #tpu.pipeline_mode<synchronous>, transform_indices = @transform_2, window_bounds = array<i64: 8, 1>}, {transform_indices = @transform_3, window_bounds = array<i64: 1, 8, 128>}]} {
    %cst = arith.constant 0.000000e+00 : f32
    %0 = vector.broadcast %cst : f32 to vector<8x128xf32>
    %c0 = arith.constant 0 : index
    %c0_0 = arith.constant 0 : index
    %c0_1 = arith.constant 0 : index
    %1 = vector.load %arg1[%c0, %c0_0, %c0_1] : memref<1x12x256xbf16, #tpu.memory_space<vmem>>, vector<1x12x128xbf16>
    %2 = vector.shape_cast %1 : vector<1x12x128xbf16> to vector<12x128xbf16>
    %c0_2 = arith.constant 0 : index
    %c0_3 = arith.constant 0 : index
    %c0_4 = arith.constant 0 : index
    %3 = vector.load %arg2[%c0_2, %c0_3, %c0_4] : memref<4x8x12xbf16, #tpu.memory_space<vmem>>, vector<1x8x12xbf16>
    %4 = vector.shape_cast %3 : vector<1x8x12xbf16> to vector<8x12xbf16>
    %cst_5 = arith.constant dense<0.000000e+00> : vector<8x128xf32>
    %5 = tpu.matmul %4, %2, %cst_5 {dimension_numbers = #tpu.dot_dimension_numbers<[1], [0], [0], [1], [0, 0, 1, 1], [], []>} : vector<8x12xbf16>, vector<12x128xbf16>, vector<8x128xf32> -> vector<8x128xf32>
    %6 = arith.addf %0, %5 : vector<8x128xf32>
    %c0_6 = arith.constant 0 : index
    %c0_7 = arith.constant 0 : index
    %c1 = arith.constant 1 : index
    %7 = vector.load %arg1[%c0_6, %c0_7, %c1] : memref<1x12x256xbf16, #tpu.memory_space<vmem>>, vector<1x12x128xbf16>
    %8 = vector.shape_cast %7 : vector<1x12x128xbf16> to vector<12x128xbf16>
    %c1_8 = arith.constant 1 : index
    %c0_9 = arith.constant 0 : index
    %c0_10 = arith.constant 0 : index
    %9 = vector.load %arg2[%c1_8, %c0_9, %c0_10] : memref<4x8x12xbf16, #tpu.memory_space<vmem>>, vector<1x8x12xbf16>
    %10 = vector.shape_cast %9 : vector<1x8x12xbf16> to vector<8x12xbf16>
    %cst_11 = arith.constant dense<0.000000e+00> : vector<8x128xf32>
    %11 = tpu.matmul %10, %8, %cst_11 {dimension_numbers = #tpu.dot_dimension_numbers<[1], [0], [0], [1], [0, 0, 1, 1], [], []>} : vector<8x12xbf16>, vector<12x128xbf16>, vector<8x128xf32> -> vector<8x128xf32>
    %12 = arith.addf %6, %11 : vector<8x128xf32>
    %c0_12 = arith.constant 0 : index
    %c0_13 = arith.constant 0 : index
    %c9 = arith.constant 9 : index
    %13 = vector.load %arg1[%c0_12, %c0_13, %c9] : memref<1x12x256xbf16, #tpu.memory_space<vmem>>, vector<1x12x128xbf16>
    %14 = vector.shape_cast %13 : vector<1x12x128xbf16> to vector<12x128xbf16>
    %c2 = arith.constant 2 : index
    %c0_14 = arith.constant 0 : index
    %c0_15 = arith.constant 0 : index
    %15 = vector.load %arg2[%c2, %c0_14, %c0_15] : memref<4x8x12xbf16, #tpu.memory_space<vmem>>, vector<1x8x12xbf16>
    %16 = vector.shape_cast %15 : vector<1x8x12xbf16> to vector<8x12xbf16>
    %cst_16 = arith.constant dense<0.000000e+00> : vector<8x128xf32>
    %17 = tpu.matmul %16, %14, %cst_16 {dimension_numbers = #tpu.dot_dimension_numbers<[1], [0], [0], [1], [0, 0, 1, 1], [], []>} : vector<8x12xbf16>, vector<12x128xbf16>, vector<8x128xf32> -> vector<8x128xf32>
    %18 = arith.addf %12, %17 : vector<8x128xf32>
    %c0_17 = arith.constant 0 : index
    %c0_18 = arith.constant 0 : index
    %c10 = arith.constant 10 : index
    %19 = vector.load %arg1[%c0_17, %c0_18, %c10] : memref<1x12x256xbf16, #tpu.memory_space<vmem>>, vector<1x12x128xbf16>
    %20 = vector.shape_cast %19 : vector<1x12x128xbf16> to vector<12x128xbf16>
    %c3 = arith.constant 3 : index
    %c0_19 = arith.constant 0 : index
    %c0_20 = arith.constant 0 : index
    %21 = vector.load %arg2[%c3, %c0_19, %c0_20] : memref<4x8x12xbf16, #tpu.memory_space<vmem>>, vector<1x8x12xbf16>
    %22 = vector.shape_cast %21 : vector<1x8x12xbf16> to vector<8x12xbf16>
    %cst_21 = arith.constant dense<0.000000e+00> : vector<8x128xf32>
    %23 = tpu.matmul %22, %20, %cst_21 {dimension_numbers = #tpu.dot_dimension_numbers<[1], [0], [0], [1], [0, 0, 1, 1], [], []>} : vector<8x12xbf16>, vector<12x128xbf16>, vector<8x128xf32> -> vector<8x128xf32>
    %24 = arith.addf %18, %23 : vector<8x128xf32>
    %c0_22 = arith.constant 0 : index
    %c0_23 = arith.constant 0 : index
    %25 = vector.load %arg3[%c0_22, %c0_23] : memref<8x1xf32, #tpu.memory_space<vmem>>, vector<8x1xf32>
    %26 = vector.broadcast %25 : vector<8x1xf32> to vector<8x128xf32>
    %27 = arith.addf %24, %26 : vector<8x128xf32>
    %c0_24 = arith.constant 0 : index
    %c0_25 = arith.constant 0 : index
    %c0_26 = arith.constant 0 : index
    %28 = vector.load %arg4[%c0_24, %c0_25, %c0_26] : memref<1x8x128xf32, #tpu.memory_space<vmem>>, vector<1x8x128xf32>
    %29 = vector.shape_cast %28 : vector<1x8x128xf32> to vector<8x128xf32>
    %30 = vector.shape_cast %27 : vector<8x128xf32> to vector<1x8x128xf32>
    tpu.vector_store %arg4[%c0_24, %c0_25, %c0_26], %30 {strides = array<i32>} : memref<1x8x128xf32, #tpu.memory_space<vmem>>, vector<1x8x128xf32>,
    return
  }
  func.func @transform_0(%arg0: i32) -> (i32, i32, i32) {
    %c0_i32 = arith.constant 0 : i32
    %c0_i32_0 = arith.constant 0 : i32
    %c0_i32_1 = arith.constant 0 : i32
    return %arg0, %c0_i32, %c0_i32_0 : i32, i32, i32
  }
  func.func @transform_1(%arg0: i32) -> (i32, i32, i32) {
    %c0_i32 = arith.constant 0 : i32
    %c0_i32_0 = arith.constant 0 : i32
    %c0_i32_1 = arith.constant 0 : i32
    %c0_i32_2 = arith.constant 0 : i32
    return %c0_i32, %c0_i32_0, %c0_i32_1 : i32, i32, i32
  }
  func.func @transform_2(%arg0: i32) -> (i32, i32) {
    %c0_i32 = arith.constant 0 : i32
    %c0_i32_0 = arith.constant 0 : i32
    %c0_i32_1 = arith.constant 0 : i32
    return %c0_i32, %c0_i32_0 : i32, i32
  }
  func.func @transform_3(%arg0: i32) -> (i32, i32, i32) {
    %c0_i32 = arith.constant 0 : i32
    %c0_i32_0 = arith.constant 0 : i32
    %c0_i32_1 = arith.constant 0 : i32
    return %arg0, %c0_i32, %c0_i32_0 : i32, i32, i32
  }
}

</mosaic_0001>

<bundles_post_ra>
// kernel: tpu_custom_call.1
= control target key start
LH: loop header
LB: loop body
LE: loop exit
PB: predicated region body
PF: predicated region fallthrough
CT: control target
= control target key end

     0   :  { %8 = vsyncpa [#allocation3], 0  ;;  %s649_s0 = inlined_call_operand.vmem [shape: bf16[2,12,256], index: 0, kind: input, shape index: {}]   ;;  %s650_s1 = inlined_call_operand.vmem [shape: bf16[4,8,12], index: 1, kind: input, shape index: {}]   ;;  %s651_s2 = inlined_call_operand.vmem [shape: f32[8,1], index: 2, kind: input, shape index: {}]   ;;  %s652_s3 = inlined_call_operand.hbm [shape: f32[2,8,128], index: 3, kind: output, shape index: {}]  }
   0x1   :  { %10 = vsyncpa [#allocation3 + $0x1], 0  ;;  %s541_s12 = smov 0   ;;  %s543_s13 = smov 0  }
   0x2   :  { %s545_s14 = smov 0   ;;  %s547_s15 = smov 0  }
   0x3 LB: > { %s562_s16 = sadd.s32 4294967295, %s515_s15   ;;  %s375_s17 = sadd.s32 4294967294, %s515_s15   ;;  %s515_s15 = sphi %s547_s15, %s658_s15   ;;  %s511_s14 = sphi %s545_s14, %s657_s14   ;;  %s507_s13 = sphi %s543_s13, %s656_s13   ;;  %s503_s12 = sphi %s541_s12, %s655_s12  }
   0x4   : > { %s566_s18 = sadd.s32 1, %s515_s15   ;;  %s91_s19 = sadd.s32 1, %s511_s14 }
   0x5   : > { %s88_s20 = ssub.s32 %s515_s15, %s566_s18  ;;  %p101_p0 = scmp.ne.s32.totalorder %s511_s14, %s507_s13 }
   0x6   : > { %p89_p1 = scmp.eq.s32.totalorder %s88_s20, 0  ;;  %p102_p2 = scmp.eq.s32.totalorder %s562_s16, 1 }
   0x7   : > { %p107_p3 = scmp.ne.s32.totalorder %s507_s13, %s503_s12  ;;  %p108_p4 = scmp.eq.s32.totalorder %s375_s17, 1 }
   0x8   : > { %s577_s21 = scalar_select %p89_p1, %s511_s14, %s91_s19  }
   0x9   : > { %p579_p5 = por %p102_p2, %p101_p0  ;;  %p583_p6 = por %p108_p4, %p107_p3 }
   0xa   : > { %p378_p7 = scmp.ge.s32.totalorder %s515_s15, 1  ;;  %p140_p8 = scmp.lt.s32.totalorder %s515_s15, 3 }
   0xc   : > { %p141_p9 = pnand %p378_p7, %p140_p8 }
   0xd   : > { %p164_p10 = scmp.lt.s32.totalorder (!%p141_p9), %s562_s16, 1  ;;  %s517_s29 = smov (!%p141_p9), 118  }
   0xe   : > { %144 = sbr.rel (%p141_p9) target bundleno = 296 (0x128), region = 32  ;;  %s518_s30 = smov (!%p141_p9), 119  }
   0xf   : > { %s519_s4 = smov (!%p141_p9), 127   ;;  %s402_s26 = sshll.u32 (!%p141_p9), %s562_s16, 3 }
  0x10   : > { %s473_s10 = scalar_lea.hbm (!%p141_p9), %s652_s3, 16 }
  0x13   : > { %s165_s24 = scalar_select %p164_p10, %s562_s16, 1  ;;  %vm195_vm0 = vcmask 1045504   ;;  %vm191_vm1 = vcmask 97280   ;;  %v172_v10 = vld [vmem:[%s650_s1] sm:$0xf]  ;;  %vm189_vm2 = vcmask 1039360  }
  0x14   : > { %v292_v12 = vld [vmem:[%s651_s2] sm:$0xff]  ;;  %v520_v13 = vmov 0   ;;  %vm242_vm3 = vcmask 973824   ;;  %vm270_vm4 = vcmask 965632   ;;  %v397_v26 = vld [vmem:[%s650_s1 + $0x8] sm:$0xf] }
  0x15   : > { %s405_s25 = sshll.u32 %s165_s24, 4  ;;  %452 = vset.pattern.permute.xlu0 %v520_v13  ;;  %v382_v17 = vld [vmem:[%s650_s1 + $0x4] sm:$0xf]  ;;  %v399_v27 = vld [vmem:[%s650_s1 + $0xc] sm:$0xf]  ;;  %s161_s24 = sand.u32 1, %s507_s13  }
  0x16   : > { %s168_s28 = scalar_lea.vmem %s649_s0, %s405_s25  ;;  %s379_s25 = sshll.u32 %s161_s24, 3 }
  0x17   : > { %v385_v0 = vld [vmem:[%s168_s28] sm:$0xf]  ;;  %v408_v1 = vld [vmem:[%s168_s28 + $0x4] sm:$0x30]  ;;  %v407_v3 = vld [vmem:[%s168_s28 + $0x4] sm:$0xf] }
  0x18   : > { %v386_v2 = vor.u32 %v408_v1, %v385_v0  ;;  %v387_v4 = vld [vmem:[%s168_s28 + $0x8] sm:$0x30]  ;;  %v394_v6 = vld [vmem:[%s168_s28] sm:$0xf]  ;;  %v406_v7 = vld [vmem:[%s168_s28 + $0x4] sm:$0x30] }
  0x19   : > { %v390_v5 = vor.u32 %v407_v3, %v387_v4  ;;  %v395_v8 = vor.u32 %v406_v7, %v394_v6  ;;  %s301_s16 = scalar_lea.sflag [#allocation3], %s161_s24 }
  0x1a   : > { %266 = vrot.lane.b32.xlu1 %v386_v2, %s517_s29  ;;  %238 = vrot.lane.b32.xlu0 %v386_v2, %s518_s30 }
  0x1b   : > { %185 = vrot.lane.b32.xlu2 %v386_v2, %s519_s4  ;;  %v221_v9 = vsel %vm195_vm0, %v395_v8, 0 }
  0x1c   : > { %230 = vmatpush.bf16.msra.mxu1 %v221_v9 }
  0x1f   : > { %396 = vmatmul.msk.bf16.vlgmr.msra.gmra.mxu1 %vm191_vm1, %v172_v10 }
  0x22   : > { %268 = vrot.lane.b32.xlu1 %v390_v5, %s517_s29  ;;  %240 = vrot.lane.b32.xlu0 %v390_v5, %s518_s30  ;;  %s311_s29 = scalar_lea.hbm %s652_s3, %s402_s26  ;;  %s163_s30 = scalar_lea.vmem [#allocation2], %s379_s25 }
  0x23   : > { %187 = vrot.lane.b32.xlu2 %v390_v5, %s519_s4  ;;  %s313_s4 = sshll.u32 %s163_s30, 4  ;;  %s315_s5 = sshll.u32 %s311_s29, 4  ;;  %s314_s4 = int_to_ptr.vmem [resolvable:$true] %s313_s4  ;;  %s316_s5 = int_to_ptr.hbm [resolvable:$true] %s315_s5 }
  0x24   : > { %s467_s6 = sshra.s32 %s316_s5, 4  ;;  %s468_s6 = int_to_ptr.hbm [resolvable:$true] %s467_s6 }
  0x25   : > { %s469_s7 = scalar_lea.hbm %s468_s6, 8  ;;  %p474_p0 = scmp.lt.s32.totalorder %s468_s6, %s652_s3 }
  0x26   : > { %p470_p11 = scmp.ne.s32.totalorder %s468_s6, %s469_s7  ;;  %p475_p1 = scmp.lt.s32.totalorder %s473_s10, %s469_s7 }
  0x28   : > { %p471_p12 = pnand %p470_p11, %p579_p5  ;;  %p476_p2 = por %p475_p1, %p474_p0 }
  0x2a   : > { %295 = vperm.xlu0 %452, %v292_v12   ;;  %p472_p13 = pneg %p471_p12 }
  0x2c   : > { %p477_p3 = pnand %p476_p2, %p472_p13 }
  0x75   : > { %v186_v11 = vpop.permute.xlu2 %185 }
  0x7d   : > { %v188_v14 = vpop.permute.xlu2 %187 }
  0x7e   : > { %v190_v15 = vsel %vm189_vm2, %v186_v11, %v188_v14 }
  0x7f   : > { %v197_v16 = vsel %vm195_vm0, %v190_v15, 0 }
  0x80   : > { %206 = vmatpush.bf16.msra.mxu0 %v197_v16 }
  0x83   : > { %391 = vmatmul.msk.bf16.vlgmr.msra.gmra.mxu0 %vm191_vm1, %v382_v17 }
  0x8c   : > { %v267_v18 = vpop.permute.xlu1 %266  ;;  %v239_v19 = vpop.permute.xlu0 %238 }
  0x94   : > { %v269_v20 = vpop.permute.xlu1 %268  ;;  %v241_v21 = vpop.permute.xlu0 %240 }
  0x95   : > { %v243_v22 = vsel %vm242_vm3, %v239_v19, %v241_v21  ;;  %v271_v23 = vsel %vm270_vm4, %v267_v18, %v269_v20 }
  0x96   : > { %v248_v24 = vsel %vm195_vm0, %v243_v22, 0  ;;  %v276_v25 = vsel %vm195_vm0, %v271_v23, 0 }
  0x97   : > { %257 = vmatpush.bf16.msra.mxu2 %v248_v24  ;;  %285 = vmatpush.bf16.msra.mxu3 %v276_v25 }
  0x9a   : > { %398 = vmatmul.msk.bf16.vlgmr.msra.gmra.mxu2 %vm191_vm1, %v397_v26  ;;  %400 = vmatmul.msk.bf16.vlgmr.msra.gmra.mxu3 %vm191_vm1, %v399_v27 }
  0x9c   : > { %v232_v28 = vpop.f32.mrf.mxu1  ;;  %v296_v36 = vpop.permute.xlu0 %295 }
  0xa4   : > { %v234_v29 = vpop.f32.mrf.mxu1 }
 0x100   : > { %v208_v30 = vpop.f32.mrf.mxu0 }
 0x101   : > { %v233_v32 = vadd.f32 %v232_v28, %v208_v30 }
 0x108   : > { %v210_v31 = vpop.f32.mrf.mxu0 }
 0x11d   : > { %v259_v33 = vpop.f32.mrf.mxu2  ;;  %v287_v34 = vpop.f32.mrf.mxu3 }
 0x11e   : > { %v263_v35 = vadd.f32 %v259_v33, %v233_v32 }
 0x120   : > { %v291_v37 = vadd.f32 %v287_v34, %v263_v35 }
 0x122   : > { %v298_v38 = vadd.f32 %v296_v36, %v291_v37 }
 0x124   : > { %299 = vst [vmem:[%s163_s30] sm:$0xff] %v298_v38 }
 0x125   : > { %v261_v39 = vpop.f32.mrf.mxu2  ;;  %v289_v40 = vpop.f32.mrf.mxu3 }
 0x126   : > { %480 = shalt.err (!%p477_p3)
}
 0x127   : > { %409 = dma.vmem_to_hbm [thread:$0]  (%p579_p5), %s314_s4, 128, %s316_s5, %s301_s16  }
 0x128 PF: > { %p415_p4 = scmp.ge.s32.totalorder %s515_s15, 2  ;;  %s327_s19 = sand.u32 1, %s503_s12  }
 0x129   : > { %s328_s20 = scalar_lea.sflag [#allocation3], %s327_s19 }
 0x12a   : > { %p412_p7 = pnand %p415_p4, %p583_p6 }
 0x12c   : > { %p413_p8 = pneg %p412_p7 }
 0x12e   : > { %498 = dma.done.wait (%p413_p8), %s328_s20, 128  }
 0x12f   : > { %500 = vsyncadd (%p413_p8), %s328_s20, 4294967168  ;;  %p13_p9 = scmp.ge.s32.totalorder %s566_s18, 4   ;;  %s655_s12 = smov %s507_s13 }
 0x130   : > { %s656_s13 = smov %s511_s14  ;;  %s657_s14 = smov %s577_s21 }
 0x131   : > { %s658_s15 = smov %s566_s18  ;;  %15 = sbr.rel (!%p13_p9) target bundleno = 3 (0x3), region = 70 }
 0x136   :  { %334 = vsyncpa [#allocation3], 1 }
 0x137   :  { %336 = vsyncpa [#allocation3 + $0x1], 1 }

</bundles_post_ra>
